<compile_context>
chip_gen: v7x
topology: tpu7x:2x2x1
jax: 0.10.0
libtpu: 0.0.40
codegen_flags: <defaults>
</compile_context>

<pallas_src>
import jax
import jax.numpy as jnp
from jax.experimental import pallas as pl
from jax.experimental.pallas import tpu as pltpu


def _force_matmul_kernel(x_ref, w_ref, o_ref):
    # x_ref: (TN, 3*C)  m=1..3 coefficients, lane-dense (node-major)
    # w_ref: (3*C, 3)   block-diagonal weights: column k holds weight[1,0,:] on rows k*C:(k+1)*C
    # o_ref: (TN, 3)    forces (f32)
    o_ref[...] = jnp.dot(x_ref[...], w_ref[...], preferred_element_type=jnp.float32)


def linear_force_head(node_embedding, weight, bias=None, *, tile_n=1024):
    """node_embedding: [N, M, C] with M >= 4 (any float dtype, bf16 recommended).
    weight: [lmax+1=2, 1, C] SO3_Linear weight. bias: [1] (unused: the head discards
    the l=0 coefficient, which is the only one the bias touches)."""
    N, M, C = node_embedding.shape
    assert M >= 4
    del bias  # bias only affects m=0, which forward() slices away (narrow(1, 1, 3))

    dt = node_embedding.dtype

    # Only the l=1 weight row is used for m=1..3 (expand_index = [0,1,1,1]).
    w1 = weight[1, 0, :].astype(dt)                                  # [C]
    # Block-diagonal [3*C, 3]: w_bd[k*C + c, j] = w1[c] if j == k else 0.
    eye3 = jnp.eye(3, dtype=dt)
    w_bd = (eye3[:, None, :] * w1[None, :, None]).reshape(3 * C, 3)  # [3*C, 3]

    # Single fused pre-pass: slice m=1..3 and flatten into a lane-dense 2-D slab.
    x2d = node_embedding[:, 1:4, :].reshape(N, 3 * C)                # [N, 3*C]

    # Tile sizing: as large as useful (per-grid-step overhead ~0.35us), multiple of 16
    # (bf16 sublane packing), adapted down so tiny inputs don't over-pad.
    tn = min(tile_n, max(16, ((N + 15) // 16) * 16))
    n_tiles = pl.cdiv(N, tn)
    n_pad = n_tiles * tn
    if n_pad != N:
        x2d = jnp.pad(x2d, ((0, n_pad - N), (0, 0)))                 # zero tail rows

    out = pl.pallas_call(
        _force_matmul_kernel,
        out_shape=jax.ShapeDtypeStruct((n_pad, 3), jnp.float32),
        grid_spec=pltpu.PrefetchScalarGridSpec(
            num_scalar_prefetch=0,
            grid=(n_tiles,),
            in_specs=[
                pl.BlockSpec((tn, 3 * C), lambda i: (i, 0)),
                pl.BlockSpec((3 * C, 3), lambda i: (0, 0)),
            ],
            out_specs=pl.BlockSpec((tn, 3), lambda i: (i, 0)),
        ),
        compiler_params=pltpu.CompilerParams(
            dimension_semantics=("parallel",),
            vmem_limit_bytes=32 * 1024 * 1024,
        ),
    )(x2d, w_bd)

    forces = out[:N]                                                 # drop padded tail
    # TODO(synk): gp_utils.gather_from_model_parallel_region (distributed gather) not modeled.
    return {"forces": forces}


def _reference(node_embedding, weight, bias):
    # Faithful SO3_Linear(lmax=1) head reference, computed in f32 from the same
    # (possibly bf16) operands the kernel sees.
    x = node_embedding[:, 0:4, :].astype(jnp.float32)
    expand_index = jnp.array([0, 1, 1, 1], dtype=jnp.int32)
    w = weight[expand_index].astype(node_embedding.dtype).astype(jnp.float32)  # [4, 1, C]
    out = jnp.einsum("bmi,moi->bmo", x, w)                                      # [N, 4, 1]
    out = out.at[:, 0:1, :].add(bias.reshape(1, 1, 1).astype(jnp.float32))
    return out[:, 1:4, :].reshape(-1, 3)


if __name__ == "__main__":
    key = jax.random.PRNGKey(0)
    N, LMAX_BACKBONE, C = 16, 2, 64          # sphere_channels = 64, (lmax_bb+1)^2 = 9 coeffs
    M = (LMAX_BACKBONE + 1) ** 2

    k_emb, k_w = jax.random.split(key)
    # keep node embeddings in bf16 end-to-end (halves HBM bytes; MXU accumulates in f32)
    node_embedding = jax.random.normal(k_emb, (N, M, C), dtype=jnp.float32).astype(jnp.bfloat16)

    # SO3_Linear(C, 1, lmax=1) parameters: weight [lmax+1, out, in], bias zeros
    bound = 1.0 / jnp.sqrt(jnp.float32(C))
    weight = jax.random.uniform(k_w, (2, 1, C), dtype=jnp.float32, minval=-bound, maxval=bound)
    bias = jnp.zeros((1,), dtype=jnp.float32)

    out = linear_force_head(node_embedding, weight, bias)
    forces = jax.block_until_ready(out["forces"])

    ref = _reference(node_embedding, weight, bias)
    assert forces.shape == (N, 3)
    assert jnp.allclose(forces, ref, atol=1e-4, rtol=1e-4), "mismatch vs reference"
    print("KERNEL_OK")
</pallas_src>

<mosaic_0001>
module attributes {stable_mosaic.version = 11 : i64} {
  func.func @_force_matmul_kernel(%arg0: i32, %arg1: memref<16x192xbf16, #tpu.memory_space<vmem>>, %arg2: memref<192x3xbf16, #tpu.memory_space<vmem>>, %arg3: memref<16x3xf32, #tpu.memory_space<vmem>>) attributes {dimension_semantics = [#tpu.dimension_semantics<parallel>], iteration_bounds = array<i64: 1>, scalar_prefetch = 0 : i64, scratch_operands = 0 : i64, tpu.core_type = #tpu.core_type<tc>, window_params = [{transform_indices = @transform_0, window_bounds = array<i64: 16, 192>}, {pipeline_mode = #tpu.pipeline_mode<synchronous>, transform_indices = @transform_1, window_bounds = array<i64: 192, 3>}, {transform_indices = @transform_2, window_bounds = array<i64: 16, 3>}]} {
    %c0 = arith.constant 0 : index
    %c0_0 = arith.constant 0 : index
    %0 = vector.load %arg1[%c0, %c0_0] : memref<16x192xbf16, #tpu.memory_space<vmem>>, vector<16x192xbf16>
    %c0_1 = arith.constant 0 : index
    %c0_2 = arith.constant 0 : index
    %1 = vector.load %arg2[%c0_1, %c0_2] : memref<192x3xbf16, #tpu.memory_space<vmem>>, vector<192x3xbf16>
    %cst = arith.constant dense<0.000000e+00> : vector<16x3xf32>
    %2 = tpu.matmul %0, %1, %cst {dimension_numbers = #tpu.dot_dimension_numbers<[1], [0], [0], [1], [0, 0, 1, 1], [], []>} : vector<16x192xbf16>, vector<192x3xbf16>, vector<16x3xf32> -> vector<16x3xf32>
    %c0_3 = arith.constant 0 : index
    %c0_4 = arith.constant 0 : index
    %3 = vector.load %arg3[%c0_3, %c0_4] : memref<16x3xf32, #tpu.memory_space<vmem>>, vector<16x3xf32>
    tpu.vector_store %arg3[%c0_3, %c0_4], %2 {strides = array<i32>} : memref<16x3xf32, #tpu.memory_space<vmem>>, vector<16x3xf32>,
    return
  }
  func.func @transform_0(%arg0: i32) -> (i32, i32) {
    %c0_i32 = arith.constant 0 : i32
    %c0_i32_0 = arith.constant 0 : i32
    return %arg0, %c0_i32 : i32, i32
  }
  func.func @transform_1(%arg0: i32) -> (i32, i32) {
    %c0_i32 = arith.constant 0 : i32
    %c0_i32_0 = arith.constant 0 : i32
    %c0_i32_1 = arith.constant 0 : i32
    return %c0_i32, %c0_i32_0 : i32, i32
  }
  func.func @transform_2(%arg0: i32) -> (i32, i32) {
    %c0_i32 = arith.constant 0 : i32
    %c0_i32_0 = arith.constant 0 : i32
    return %arg0, %c0_i32 : i32, i32
  }
}

</mosaic_0001>

<bundles_post_ra>
// kernel: tpu_custom_call.1
= control target key start
LH: loop header
LB: loop body
LE: loop exit
PB: predicated region body
PF: predicated region fallthrough
CT: control target
= control target key end

     0   :  { %v202_v0 = vmov 0   ;;  %vm119_vm0 = vcmask 523264   ;;  %vm164_vm1 = vcmask 23552   ;;  %s266_s1 = inlined_call_operand.vmem [shape: bf16[192,3], index: 1, kind: input, shape index: {}]   ;;  %s267_s0 = inlined_call_operand.vmem [shape: bf16[16,192], index: 0, kind: input, shape index: {}]   ;;  %s268_s2 = inlined_call_operand.vmem [shape: f32[16,3], index: 2, kind: output, shape index: {}]  }
   0x1   :  { %123 = vmatprep.subr.bf16.mxu0 %v202_v0  ;;  %v187_v1 = vld [vmem:[%s266_s1] sm:$0xff]   ;;  %v188_v2 = vld [vmem:[%s266_s1 + $0x8] sm:$0xff]   ;;  %v189_v3 = vld [vmem:[%s266_s1 + $0x10] sm:$0xff]  }
   0x2   :  { %124 = vmatpush1.bf16.msra.mxu0 %v187_v1  ;;  %v190_v4 = vld [vmem:[%s266_s1 + $0x18] sm:$0xff]   ;;  %v201_v5 = vld [vmem:[%s267_s0 + $0x4] ss:$8 sps:$4 sm:$0xff]   ;;  %v193_v8 = vld [vmem:[%s266_s1 + $0x30] sm:$0xff]  }
   0x3   :  { %125 = vmatprep.subr.bf16.mxu0 %v202_v0  ;;  %v191_v6 = vld [vmem:[%s266_s1 + $0x20] sm:$0xff]   ;;  %185 = vmatprep.mubr.msk.bf16.mxu0 %vm119_vm0, %v201_v5  ;;  %v192_v7 = vld [vmem:[%s266_s1 + $0x28] sm:$0xff]   ;;  %v194_v9 = vld [vmem:[%s266_s1 + $0x38] sm:$0xff]  }
   0x4   :  { %v195_v10 = vld [vmem:[%s266_s1 + $0x40] sm:$0xff]   ;;  %v196_v11 = vld [vmem:[%s266_s1 + $0x48] sm:$0xff]   ;;  %v197_v12 = vld [vmem:[%s266_s1 + $0x50] sm:$0xff]  }
   0x5   :  { %v198_v13 = vld [vmem:[%s266_s1 + $0x58] sm:$0xff]   ;;  %v199_v14 = vld [vmem:[%s267_s0] ss:$8 sps:$4 sm:$0xff]  }
   0x6   :  { %126 = vmatpush1.bf16.msra.mxu0 %v188_v2 }
   0x7   :  { %127 = vmatprep.subr.bf16.mxu0 %v202_v0 }
   0xa   :  { %128 = vmatpush1.bf16.msra.mxu0 %v189_v3 }
   0xb   :  { %129 = vmatprep.subr.bf16.mxu0 %v202_v0 }
   0xe   :  { %130 = vmatpush1.bf16.msra.mxu0 %v190_v4 }
   0xf   :  { %131 = vmatprep.subr.bf16.mxu0 %v202_v0 }
  0x12   :  { %132 = vmatpush1.bf16.msra.mxu0 %v191_v6 }
  0x13   :  { %133 = vmatprep.subr.bf16.mxu0 %v202_v0 }
  0x16   :  { %134 = vmatpush1.bf16.msra.mxu0 %v192_v7 }
  0x17   :  { %135 = vmatprep.subr.bf16.mxu0 %v202_v0 }
  0x1a   :  { %136 = vmatpush1.bf16.msra.mxu0 %v193_v8 }
  0x1b   :  { %137 = vmatprep.subr.bf16.mxu0 %v202_v0 }
  0x1e   :  { %138 = vmatpush1.bf16.msra.mxu0 %v194_v9 }
  0x1f   :  { %139 = vmatprep.subr.bf16.mxu0 %v202_v0 }
  0x22   :  { %140 = vmatpush1.bf16.msra.mxu0 %v195_v10 }
  0x23   :  { %141 = vmatprep.subr.bf16.mxu0 %v202_v0 }
  0x26   :  { %142 = vmatpush1.bf16.msra.mxu0 %v196_v11 }
  0x27   :  { %143 = vmatprep.subr.bf16.mxu0 %v202_v0 }
  0x2a   :  { %144 = vmatpush1.bf16.msra.mxu0 %v197_v12 }
  0x2b   :  { %145 = vmatprep.subr.bf16.mxu0 %v202_v0 }
  0x2e   :  { %146 = vmatpush1.bf16.msra.mxu0 %v198_v13 }
  0x31   :  { %156 = vmatmul.mubr.bf16.vlgmr.msra.gmra.mrb[0].mxu0 %v199_v14 }
 0x104   :  { %v157_v15 = vpop.f32.mrb[0].mxu0 }
 0x105   :  { %165 = vst.msk [vmem:[%s268_s2] sm:$0xff] %vm164_vm1, %v157_v15  ;;  %v159_v16 = vpop.f32.mrb[1].mxu0 }
 0x106   :  { %v160_v17 = vpop.f32.mrb[2].mxu0 }
 0x107   :  { %166 = vst.msk [vmem:[%s268_s2 + $0x8] sm:$0xff] %vm164_vm1, %v160_v17  ;;  %v162_v18 = vpop.f32.mrb[3].mxu0 }

</bundles_post_ra>
